<compile_context>
chip_gen: v6e
topology: v6e:2x2x1
jax: 0.10.0
libtpu: 0.0.40
codegen_flags: <defaults>
</compile_context>

<pallas_src>
import functools

import jax
import jax.numpy as jnp
from jax import lax
from jax.experimental import pallas as pl
from jax.experimental.pallas import tpu as pltpu


def _gram_kernel(z_ref, g_ref):
    # z_ref: (BB, T, E)  ->  g_ref: (BB, E, 2E) = [x^T x | x^T y]  per batch.
    zb = z_ref[...]                    # single load of the whole block
    M = zb.shape[1] - 1
    x = zb[:, :M, :]                   # (BB, M, E)
    y = zb[:, 1:, :]                   # (BB, M, E)
    xy = jnp.concatenate([x, y], axis=-1)          # (BB, M, 2E) fused RHS
    # Contract the time axis (dim 1), batch over dim 0 -> batched MXU matmul.
    dn = (((1,), (1,)), ((0,), (0,)))
    g_ref[...] = lax.dot_general(x, xy, dn, preferred_element_type=jnp.float32)


def _predict_kernel(pred_len, z_ref, k_ref, rec_ref, preds_ref):
    # z_ref: (BB, T, E), k_ref: (BB, E, E)
    # rec_ref: (BB, T, E) (full z_rec), preds_ref: (BB, pred_len, E)
    zb = z_ref[...]
    K = k_ref[...]
    M = zb.shape[1] - 1
    dn = (((2,), (1,)), ((0,), (0,)))  # batched (.., E) @ (E, E)

    # Reconstruction: row 0 is z[:, 0], rows 1..T-1 are x @ K.
    x = zb[:, :M, :]
    rec = lax.dot_general(x, K, dn, preferred_element_type=jnp.float32)
    rec_ref[:, :1, :] = zb[:, :1, :].astype(rec_ref.dtype)
    rec_ref[:, 1:, :] = rec.astype(rec_ref.dtype)

    # Batched autoregressive rollout; pred_len is static so the loop unrolls
    # and each step is stored directly into the output block.
    p = zb[:, M:, :]                   # (BB, 1, E) == z[:, -1:, :]
    for i in range(pred_len):
        p = lax.dot_general(p, K, dn, preferred_element_type=jnp.float32)
        preds_ref[:, i:i + 1, :] = p.astype(preds_ref.dtype)


def kp_layer_ar_forward(z, pred_len=1, batch_block=8):
    """JAX/Pallas equivalent of KPLayer_AR.forward(z, pred_len)."""
    assert pred_len >= 1, "Prediction length should not be less than 1."
    B, T, E = z.shape
    assert T > 1, "Snapshots number should be larger than 1."
    M = T - 1
    assert M >= E, "This implementation assumes the well-determined case M >= E."

    z = z.astype(jnp.float32)

    # Batch blocking: BB batch elements per grid step (pad B if needed).
    BB = min(B, batch_block)
    Bp = pl.cdiv(B, BB) * BB
    zp = z if Bp == B else jnp.pad(z, ((0, Bp - B), (0, 0), (0, 0)))
    nb = Bp // BB

    # ---- Pallas kernel 1: fused per-batch Gram matrices [x^T x | x^T y] ----
    gram = pl.pallas_call(
        _gram_kernel,
        out_shape=jax.ShapeDtypeStruct((Bp, E, 2 * E), jnp.float32),
        grid=(nb,),
        in_specs=[pl.BlockSpec((BB, T, E), lambda b: (b, 0, 0))],
        out_specs=pl.BlockSpec((BB, E, 2 * E), lambda b: (b, 0, 0)),
        compiler_params=pltpu.CompilerParams(dimension_semantics=("parallel",)),
    )(zp)

    xtx = gram[:, :, :E]               # (Bp, E, E)
    xty = gram[:, :, E:]               # (Bp, E, E)

    # TODO(synk): torch.linalg.lstsq (QR-based batched least squares) has no
    # clean Pallas equivalent; solve the normal equations in XLA glue.
    K = jnp.linalg.solve(xtx, xty)     # (Bp, E, E)

    # Guard: the module replaces a NaN K with identity. Normal equations can
    # also yield Inf where lstsq would NaN, so check for any non-finite value.
    bad = ~jnp.isfinite(K).all(axis=(1, 2), keepdims=True)
    eye = jnp.broadcast_to(jnp.eye(E, dtype=K.dtype), (Bp, E, E))
    K = jnp.where(bad, eye, K)

    # ---- Pallas kernel 2: full z_rec + batched autoregressive rollout ------
    z_rec, z_preds = pl.pallas_call(
        functools.partial(_predict_kernel, pred_len),
        out_shape=(
            jax.ShapeDtypeStruct((Bp, T, E), jnp.float32),
            jax.ShapeDtypeStruct((Bp, pred_len, E), jnp.float32),
        ),
        grid=(nb,),
        in_specs=[
            pl.BlockSpec((BB, T, E), lambda b: (b, 0, 0)),
            pl.BlockSpec((BB, E, E), lambda b: (b, 0, 0)),
        ],
        out_specs=(
            pl.BlockSpec((BB, T, E), lambda b: (b, 0, 0)),
            pl.BlockSpec((BB, pred_len, E), lambda b: (b, 0, 0)),
        ),
        compiler_params=pltpu.CompilerParams(dimension_semantics=("parallel",)),
    )(zp, K)

    if Bp != B:
        z_rec = z_rec[:B]
        z_preds = z_preds[:B]
    return z_rec, z_preds


def _reference_forward(z, pred_len):
    """Plain-JAX reference of the same math (for verification)."""
    z = z.astype(jnp.float32)
    x, y = z[:, :-1, :], z[:, 1:, :]
    xtx = jnp.einsum("bme,bmf->bef", x, x)
    xty = jnp.einsum("bme,bmf->bef", x, y)
    K = jnp.linalg.solve(xtx, xty)
    bad = ~jnp.isfinite(K).all(axis=(1, 2), keepdims=True)
    eye = jnp.broadcast_to(jnp.eye(z.shape[-1], dtype=K.dtype), K.shape)
    K = jnp.where(bad, eye, K)
    z_rec = jnp.concatenate([z[:, :1, :], jnp.einsum("bme,bef->bmf", x, K)], axis=1)
    p = z[:, -1:, :]
    preds = []
    for _ in range(pred_len):
        p = jnp.einsum("bme,bef->bmf", p, K)
        preds.append(p)
    return z_rec, jnp.concatenate(preds, axis=1)


if __name__ == "__main__":
    B, T, E = 8, 17, 16   # B x input_len x E, with (T-1) >= E so lstsq is well-determined
    pred_len = 4

    key = jax.random.PRNGKey(0)
    z = jax.random.normal(key, (B, T, E), dtype=jnp.float32)

    z_rec, z_preds = kp_layer_ar_forward(z, pred_len=pred_len)
    z_rec = jax.block_until_ready(z_rec)
    z_preds = jax.block_until_ready(z_preds)

    assert z_rec.shape == (B, T, E)
    assert z_preds.shape == (B, pred_len, E)

    ref_rec, ref_preds = _reference_forward(z, pred_len)
    assert jnp.allclose(z_rec, ref_rec, atol=1e-4, rtol=1e-4)
    assert jnp.allclose(z_preds, ref_preds, atol=1e-4, rtol=1e-4)

    print("KERNEL_OK")
</pallas_src>

<mosaic_0001>
module attributes {stable_mosaic.version = 11 : i64} {
  func.func @_gram_kernel(%arg0: i32, %arg1: memref<8x17x16xf32, #tpu.memory_space<vmem>>, %arg2: memref<8x16x32xf32, #tpu.memory_space<vmem>>) attributes {dimension_semantics = [#tpu.dimension_semantics<parallel>], iteration_bounds = array<i64: 1>, scalar_prefetch = 0 : i64, scratch_operands = 0 : i64, tpu.core_type = #tpu.core_type<tc>, window_params = [{transform_indices = @transform_0, window_bounds = array<i64: 8, 17, 16>}, {transform_indices = @transform_1, window_bounds = array<i64: 8, 16, 32>}]} {
    %c0 = arith.constant 0 : index
    %c0_0 = arith.constant 0 : index
    %c0_1 = arith.constant 0 : index
    %0 = vector.load %arg1[%c0, %c0_0, %c0_1] : memref<8x17x16xf32, #tpu.memory_space<vmem>>, vector<8x17x16xf32>
    %1 = vector.extract_strided_slice %0 {offsets = [0, 0, 0], sizes = [8, 16, 16], strides = [1, 1, 1]} : vector<8x17x16xf32> to vector<8x16x16xf32>
    %2 = vector.extract_strided_slice %0 {offsets = [0, 1, 0], sizes = [8, 16, 16], strides = [1, 1, 1]} : vector<8x17x16xf32> to vector<8x16x16xf32>
    %3 = tpu.concatenate %1, %2 in 2 : vector<8x16x16xf32>, vector<8x16x16xf32> -> vector<8x16x32xf32>
    %cst = arith.constant dense<0.000000e+00> : vector<8x16x32xf32>
    %4 = tpu.matmul %1, %3, %cst {dimension_numbers = #tpu.dot_dimension_numbers<[1], [1], [2], [2], [0, 0, 0, 2, 1, 2], [0], [0]>} : vector<8x16x16xf32>, vector<8x16x32xf32>, vector<8x16x32xf32> -> vector<8x16x32xf32>
    %c0_2 = arith.constant 0 : index
    %c0_3 = arith.constant 0 : index
    %c0_4 = arith.constant 0 : index
    %5 = vector.load %arg2[%c0_2, %c0_3, %c0_4] : memref<8x16x32xf32, #tpu.memory_space<vmem>>, vector<8x16x32xf32>
    tpu.vector_store %arg2[%c0_2, %c0_3, %c0_4], %4 {strides = array<i32>} : memref<8x16x32xf32, #tpu.memory_space<vmem>>, vector<8x16x32xf32>,
    return
  }
  func.func @transform_0(%arg0: i32) -> (i32, i32, i32) {
    %c0_i32 = arith.constant 0 : i32
    %c0_i32_0 = arith.constant 0 : i32
    %c0_i32_1 = arith.constant 0 : i32
    return %arg0, %c0_i32, %c0_i32_0 : i32, i32, i32
  }
  func.func @transform_1(%arg0: i32) -> (i32, i32, i32) {
    %c0_i32 = arith.constant 0 : i32
    %c0_i32_0 = arith.constant 0 : i32
    %c0_i32_1 = arith.constant 0 : i32
    return %arg0, %c0_i32, %c0_i32_0 : i32, i32, i32
  }
}

</mosaic_0001>

<bundles_post_ra>
// kernel: tpu_custom_call.1
= control target key start
LH: loop header
LB: loop body
LE: loop exit
PB: predicated region body
PF: predicated region fallthrough
CT: control target
= control target key end

     0   :  { %vm57_vm0 = vcmask 1046528   ;;  %s1231_s26 = smov 16   ;;  %s1480_s0 = inlined_call_operand.vmem [shape: f32[8,17,16], index: 0, kind: input, shape index: {}]   ;;  %s1481_s1 = inlined_call_operand.hbm [shape: f32[8,16,32], index: 1, kind: output, shape index: {}]  }
   0x1   :  { %v1248_v0 = vld [vmem:[%s1480_s0 + $0x8] sm:$0xff]  ;;  %v11_v1 = vld [vmem:[%s1480_s0 + $0x10] sm:$0x1]  ;;  %v1256_v2 = vld [vmem:[%s1480_s0] sm:$0xff] }
   0x2   :  { %v59_v3 = vrot.slane %v1248_v0, 1  ;;  %v61_v4 = vrot.slane %v11_v1, 1  ;;  %v58_v5 = vrot.slane %v1256_v2, 1  ;;  %v1263_v6 = vld [vmem:[%s1480_s0 + $0x20] sm:$0xff]  ;;  %v14_v7 = vld [vmem:[%s1480_s0 + $0x28] sm:$0x1] }
   0x3   :  { %v64_v8 = vrot.slane %v1263_v6, 1  ;;  %v66_v9 = vrot.slane %v14_v7, 1  ;;  %v1272_v10 = vld [vmem:[%s1480_s0 + $0x18] sm:$0xff]  ;;  %v17_v12 = vld [vmem:[%s1480_s0 + $0x40] sm:$0x1]  ;;  %v1288_v16 = vld [vmem:[%s1480_s0 + $0x50] sm:$0xff] }
   0x4   :  { %v1277_v11 = vld [vmem:[%s1480_s0 + $0x38] sm:$0xff]  ;;  %v62_v13 = vsel %vm57_vm0, %v59_v3, %v61_v4  ;;  %v60_v14 = vsel %vm57_vm0, %v58_v5, %v59_v3  ;;  %v63_v15 = vrot.slane %v1272_v10, 1  ;;  %v71_v21 = vrot.slane %v17_v12, 1  ;;  %v1302_v24 = vld [vmem:[%s1480_s0 + $0x30] sm:$0xff]  ;;  %v1307_v25 = vld [vmem:[%s1480_s0 + $0x48] sm:$0xff] }
   0x5   :  { %v20_v17 = vld [vmem:[%s1480_s0 + $0x58] sm:$0x1]  ;;  %100 = vrot.lane.b32.xlu0 %v62_v13, %s1231_s26  ;;  %98 = vrot.lane.b32.xlu1 %v60_v14, %s1231_s26  ;;  %v67_v18 = vsel %vm57_vm0, %v64_v8, %v66_v9  ;;  %v69_v19 = vrot.slane %v1277_v11, 1  ;;  %v74_v22 = vrot.slane %v1288_v16, 1  ;;  %v1314_v26 = vld [vmem:[%s1480_s0 + $0x68] sm:$0xff]  ;;  %v68_v29 = vrot.slane %v1302_v24, 1 }
   0x6   :  { %v65_v20 = vsel %vm57_vm0, %v63_v15, %v64_v8  ;;  %v76_v23 = vrot.slane %v20_v17, 1  ;;  %v73_v30 = vrot.slane %v1307_v25, 1  ;;  %v23_v31 = vld [vmem:[%s1480_s0 + $0x70] sm:$0x1] }
   0x7   :  { %v72_v27 = vsel %vm57_vm0, %v69_v19, %v71_v21 }
   0x8   :  { %v77_v28 = vsel %vm57_vm0, %v74_v22, %v76_v23 }
   0x9   :  { %104 = vrot.lane.b32.xlu0 %v67_v18, %s1231_s26  ;;  %102 = vrot.lane.b32.xlu1 %v65_v20, %s1231_s26 }
   0xa   :  { %6 = vsyncpa [#allocation3], 0  ;;  %v1326_v32 = vld [vmem:[%s1480_s0 + $0x80] sm:$0xff]  ;;  %v26_v33 = vld [vmem:[%s1480_s0 + $0x88] sm:$0x1]  ;;  %v79_v34 = vrot.slane %v1314_v26, 1  ;;  %v70_v36 = vsel %vm57_vm0, %v68_v29, %v69_v19  ;;  %v75_v37 = vsel %vm57_vm0, %v73_v30, %v74_v22 }
   0xb   :  { %v81_v35 = vrot.slane %v23_v31, 1  ;;  %v84_v38 = vrot.slane %v1326_v32, 1  ;;  %v86_v39 = vrot.slane %v26_v33, 1  ;;  %v1340_v40 = vld [vmem:[%s1480_s0 + $0x60] sm:$0xff]  ;;  %v1345_v41 = vld [vmem:[%s1480_s0 + $0x78] sm:$0xff]  ;;  %v1364_v48 = vld [vmem:[%s1480_s0 + $0xb0] sm:$0xff] }
   0xc   :  { %v78_v44 = vrot.slane %v1340_v40, 1  ;;  %v83_v45 = vrot.slane %v1345_v41, 1  ;;  %v1356_v46 = vld [vmem:[%s1480_s0 + $0x98] sm:$0xff]  ;;  %v29_v47 = vld [vmem:[%s1480_s0 + $0xa0] sm:$0x1]  ;;  %v94_v54 = vrot.slane %v1364_v48, 1 }
   0xd   :  { %108 = vrot.lane.b32.xlu0 %v72_v27, %s1231_s26  ;;  %112 = vrot.lane.b32.xlu1 %v77_v28, %s1231_s26  ;;  %v82_v42 = vsel %vm57_vm0, %v79_v34, %v81_v35  ;;  %v87_v43 = vsel %vm57_vm0, %v84_v38, %v86_v39  ;;  %v32_v49 = vld [vmem:[%s1480_s0 + $0xb8] sm:$0x1]  ;;  %v89_v50 = vrot.slane %v1356_v46, 1  ;;  %v91_v51 = vrot.slane %v29_v47, 1  ;;  %v1378_v56 = vld [vmem:[%s1480_s0 + $0x90] sm:$0xff] }
   0xe   :  { %v80_v52 = vsel %vm57_vm0, %v78_v44, %v79_v34  ;;  %v85_v53 = vsel %vm57_vm0, %v83_v45, %v84_v38  ;;  %v96_v55 = vrot.slane %v32_v49, 1  ;;  %v1383_v57 = vld [vmem:[%s1480_s0 + $0xa8] sm:$0xff]  ;;  %v88_v60 = vrot.slane %v1378_v56, 1  ;;  %s1232_s0 = smov [#allocation2]  }
   0xf   :  { %v92_v58 = vsel %vm57_vm0, %v89_v50, %v91_v51  ;;  %v93_v61 = vrot.slane %v1383_v57, 1  ;;  %vm146_vm1 = vcmask 130048   ;;  %vm1067_vm2 = vcmask 261120  }
  0x10   :  { %v97_v59 = vsel %vm57_vm0, %v94_v54, %v96_v55  ;;  %v90_v62 = vsel %vm57_vm0, %v88_v60, %v89_v50 }
  0x11   :  { %106 = vrot.lane.b32.xlu0 %v70_v36, %s1231_s26  ;;  %110 = vrot.lane.b32.xlu1 %v75_v37, %s1231_s26  ;;  %v95_v63 = vsel %vm57_vm0, %v93_v61, %v94_v54 }
  0x15   :  { %116 = vrot.lane.b32.xlu0 %v82_v42, %s1231_s26  ;;  %120 = vrot.lane.b32.xlu1 %v87_v43, %s1231_s26 }
  0x19   :  { %114 = vrot.lane.b32.xlu0 %v80_v52, %s1231_s26  ;;  %118 = vrot.lane.b32.xlu1 %v85_v53, %s1231_s26 }
  0x1d   :  { %124 = vrot.lane.b32.xlu0 %v92_v58, %s1231_s26  ;;  %128 = vrot.lane.b32.xlu1 %v97_v59, %s1231_s26 }
  0x21   :  { %122 = vrot.lane.b32.xlu0 %v90_v62, %s1231_s26  ;;  %126 = vrot.lane.b32.xlu1 %v95_v63, %s1231_s26  ;;  %s1089_s26 = sshll.u32 %s1232_s0, 4  ;;  %s1090_s26 = int_to_ptr.vmem [resolvable:$true] %s1089_s26 }
  0x22   :  { %s1209_s27 = scalar_lea.vmem %s1090_s26, 2048  ;;  %p1214_p1 = scmp.lt.s32.totalorder %s1090_s26, %s1090_s26 }
  0x23   :  { %p1210_p0 = scmp.ne.s32.totalorder %s1090_s26, %s1209_s27  ;;  %p1215_p2 = scmp.lt.s32.totalorder %s1209_s27, %s1209_s27 }
  0x25   :  { %p1216_p3 = por %p1215_p2, %p1214_p1 }
  0x27   :  { %p1217_p4 = pnand %p1216_p3, %p1210_p0 }
  0x3f   :  { %163 = vxpose.xlu0.b32.start [1/2] (short) (narrow) %v1256_v2, 16 }
  0x43   :  { %164 = vxpose.xlu0.b32.end [2/2] (short) (narrow) %v1248_v0, 16 }
  0x47   :  { %389 = vxpose.xlu0.b32.start [1/2] (short) (narrow) %v1302_v24, 16 }
  0x4a   :  { %276 = vxpose.xlu1.b32.start [1/2] (short) (narrow) %v1272_v10, 16 }
  0x4b   :  { %390 = vxpose.xlu0.b32.end [2/2] (short) (narrow) %v1277_v11, 16 }
  0x4e   :  { %277 = vxpose.xlu1.b32.end [2/2] (short) (narrow) %v1263_v6, 16 }
  0x4f   :  { %502 = vxpose.xlu0.b32.start [1/2] (short) (narrow) %v1307_v25, 16 }
  0x52   :  { %615 = vxpose.xlu1.b32.start [1/2] (short) (narrow) %v1340_v40, 16 }
  0x53   :  { %503 = vxpose.xlu0.b32.end [2/2] (short) (narrow) %v1288_v16, 16 }
  0x56   :  { %616 = vxpose.xlu1.b32.end [2/2] (short) (narrow) %v1314_v26, 16 }
  0x57   :  { %728 = vxpose.xlu0.b32.start [1/2] (short) (narrow) %v1345_v41, 16 }
  0x5a   :  { %841 = vxpose.xlu1.b32.start [1/2] (short) (narrow) %v1378_v56, 16 }
  0x5b   :  { %729 = vxpose.xlu0.b32.end [2/2] (short) (narrow) %v1326_v32, 16 }
  0x5e   :  { %842 = vxpose.xlu1.b32.end [2/2] (short) (narrow) %v1356_v46, 16 }
  0x5f   :  { %954 = vxpose.xlu0.b32.start [1/2] (short) (narrow) %v1383_v57, 16 }
  0x63   :  { %955 = vxpose.xlu0.b32.end [2/2] (short) (narrow) %v1364_v48, 16 }
  0x77   :  { %v101_v1 = vpop.permute.xlu0 %100  ;;  %v99_v3 = vpop.permute.xlu1 %98 }
  0x78   :  { %v148_v4 = vsel %vm146_vm1, %v1248_v0, %v101_v1  ;;  %v147_v5 = vsel %vm146_vm1, %v1256_v2, %v99_v3 }
  0x79   :  { %1148 = vmatprep.subr.mxu0 %v148_v4 }
  0x7a   :  { %1149 = vmatpush3.msra.mxu0 %v148_v4 }
  0x7b   :  { %v105_v7 = vpop.permute.xlu0 %104  ;;  %1150 = vmatprep.subr.mxu0 %v147_v5  ;;  %v103_v8 = vpop.permute.xlu1 %102 }
  0x7c   :  { %v150_v9 = vsel %vm146_vm1, %v1263_v6, %v105_v7  ;;  %1151 = vmatpush3.msra.mxu0 %v147_v5  ;;  %v149_v12 = vsel %vm146_vm1, %v1272_v10, %v103_v8 }
  0x7d   :  { %1155 = vmatprep.subr.mxu1 %v150_v9 }
  0x7e   :  { %1156 = vmatpush3.msra.mxu1 %v150_v9 }
  0x7f   :  { %v109_v13 = vpop.permute.xlu0 %108  ;;  %1157 = vmatprep.subr.mxu1 %v149_v12  ;;  %v113_v0 = vpop.permute.xlu1 %112 }
  0x80   :  { %v152_v2 = vsel %vm146_vm1, %v1277_v11, %v109_v13  ;;  %1158 = vmatpush3.msra.mxu1 %v149_v12  ;;  %v154_v14 = vsel %vm146_vm1, %v1288_v16, %v113_v0 }
  0x81   :  { %1162 = vmatprep.subr.mxu0 %v152_v2  ;;  %1169 = vmatprep.subr.mxu1 %v154_v14 }
  0x83   :  { %v107_v15 = vpop.permute.xlu0 %106  ;;  %v111_v17 = vpop.permute.xlu1 %110 }
  0x84   :  { %v151_v11 = vsel %vm146_vm1, %v1302_v24, %v107_v15  ;;  %v153_v35 = vsel %vm146_vm1, %v1307_v25, %v111_v17 }
  0x87   :  { %v117_v6 = vpop.permute.xlu0 %116  ;;  %v121_v19 = vpop.permute.xlu1 %120 }
  0x88   :  { %v156_v29 = vsel %vm146_vm1, %v1314_v26, %v117_v6  ;;  %v158_v36 = vsel %vm146_vm1, %v1326_v32, %v121_v19 }
  0x8b   :  { %v115_v18 = vpop.permute.xlu0 %114  ;;  %v119_v20 = vpop.permute.xlu1 %118 }
  0x8c   :  { %v155_v24 = vsel %vm146_vm1, %v1340_v40, %v115_v18  ;;  %v157_v39 = vsel %vm146_vm1, %v1345_v41, %v119_v20 }
  0x8f   :  { %v125_v10 = vpop.permute.xlu0 %124  ;;  %v129_v23 = vpop.permute.xlu1 %128 }
  0x90   :  { %v160_v26 = vsel %vm146_vm1, %v1356_v46, %v125_v10  ;;  %v162_v32 = vsel %vm146_vm1, %v1364_v48, %v129_v23 }
  0x93   :  { %v123_v21 = vpop.permute.xlu0 %122  ;;  %v127_v16 = vpop.permute.xlu1 %126 }
  0x94   :  { %v159_v42 = vsel %vm146_vm1, %v1378_v56, %v123_v21  ;;  %v161_v44 = vsel %vm146_vm1, %v1383_v57, %v127_v16 }
  0xbb   :  { %v179_v22 = vpop.trf.xlu0 }
  0xbc   :  { %1152 = vmatprep.mubr.msk.f32.mxu0 %vm146_vm1, %v179_v22 }
  0xbf   :  { %v180_v27 = vpop.trf.xlu0 }
  0xc0   :  { %1153 = vmatmul.mubr.msk.f32.vlgmr.msra.gmra.mxu0 %vm146_vm1, %v180_v27 }
  0xc1   :  { %1163 = vmatpush3.msra.mxu0 %v152_v2 }
  0xc2   :  { %1164 = vmatprep.subr.mxu0 %v151_v11 }
  0xc3   :  { %1165 = vmatpush3.msra.mxu0 %v151_v11  ;;  %v405_v28 = vpop.trf.xlu0 }
  0xc4   :  { %1176 = vmatprep.subr.mxu0 %v156_v29  ;;  %1166 = vmatprep.mubr.msk.f32.mxu0 %vm146_vm1, %v405_v28 }
  0xc6   :  { %v292_v30 = vpop.trf.xlu1 }
  0xc7   :  { %v406_v31 = vpop.trf.xlu0  ;;  %1159 = vmatprep.mubr.msk.f32.mxu1 %vm146_vm1, %v292_v30 }
  0xc8   :  { %1167 = vmatmul.mubr.msk.f32.vlgmr.msra.gmra.mxu0 %vm146_vm1, %v406_v31 }
  0xc9   :  { %1177 = vmatpush3.msra.mxu0 %v156_v29 }
  0xca   :  { %1178 = vmatprep.subr.mxu0 %v155_v24  ;;  %v293_v33 = vpop.trf.xlu1 }
  0xcb   :  { %1179 = vmatpush3.msra.mxu0 %v155_v24  ;;  %v518_v34 = vpop.trf.xlu0  ;;  %1160 = vmatmul.mubr.msk.f32.vlgmr.msra.gmra.mxu1 %vm146_vm1, %v293_v33 }
  0xcc   :  { %1170 = vmatpush3.msra.mxu1 %v154_v14  ;;  %1190 = vmatprep.subr.mxu0 %v160_v26 }
  0xcd   :  { %1171 = vmatprep.subr.mxu1 %v153_v35  ;;  %1173 = vmatprep.mubr.msk.f32.mxu1 %vm146_vm1, %v518_v34 }
  0xce   :  { %1172 = vmatpush3.msra.mxu1 %v153_v35  ;;  %v631_v37 = vpop.trf.xlu1 }
  0xcf   :  { %1183 = vmatprep.subr.mxu1 %v158_v36  ;;  %v519_v38 = vpop.trf.xlu0  ;;  %1180 = vmatprep.mubr.msk.f32.mxu0 %vm146_vm1, %v631_v37 }
  0xd0   :  { %1174 = vmatmul.mubr.msk.f32.vlgmr.msra.gmra.mxu1 %vm146_vm1, %v519_v38 }
  0xd1   :  { %1184 = vmatpush3.msra.mxu1 %v158_v36 }
  0xd2   :  { %1185 = vmatprep.subr.mxu1 %v157_v39  ;;  %v632_v25 = vpop.trf.xlu1 }
  0xd3   :  { %1186 = vmatpush3.msra.mxu1 %v157_v39  ;;  %v744_v40 = vpop.trf.xlu0  ;;  %1181 = vmatmul.mubr.msk.f32.vlgmr.msra.gmra.mxu0 %vm146_vm1, %v632_v25 }
  0xd4   :  { %1191 = vmatpush3.msra.mxu0 %v160_v26  ;;  %1197 = vmatprep.subr.mxu1 %v162_v32 }
  0xd5   :  { %1187 = vmatprep.mubr.msk.f32.mxu1 %vm146_vm1, %v744_v40  ;;  %1192 = vmatprep.subr.mxu0 %v159_v42 }
  0xd6   :  { %1193 = vmatpush3.msra.mxu0 %v159_v42  ;;  %v857_v43 = vpop.trf.xlu1 }
  0xd7   :  { %v745_v41 = vpop.trf.xlu0  ;;  %1194 = vmatprep.mubr.msk.f32.mxu0 %vm146_vm1, %v857_v43 }
  0xd8   :  { %1188 = vmatmul.mubr.msk.f32.vlgmr.msra.gmra.mxu1 %vm146_vm1, %v745_v41 }
  0xd9   :  { %1198 = vmatpush3.msra.mxu1 %v162_v32 }
  0xda   :  { %1199 = vmatprep.subr.mxu1 %v161_v44  ;;  %v858_v45 = vpop.trf.xlu1 }
  0xdb   :  { %1200 = vmatpush3.msra.mxu1 %v161_v44  ;;  %v970_v46 = vpop.trf.xlu0  ;;  %1195 = vmatmul.mubr.msk.f32.vlgmr.msra.gmra.mxu0 %vm146_vm1, %v858_v45 }
  0xdc   :  { %1201 = vmatprep.mubr.msk.f32.mxu1 %vm146_vm1, %v970_v46 }
  0xdf   :  { %v971_v47 = vpop.trf.xlu0 }
  0xe0   :  { %1202 = vmatmul.mubr.msk.f32.vlgmr.msra.gmra.mxu1 %vm146_vm1, %v971_v47 }
 0x180   :  { %v1154_v48 = vpop.f32.mrf.mxu0 }
 0x181   :  { %1069 = vst.msk [vmem:[#allocation2 + $0x8] sm:$0xff] %vm1067_vm2, %v1154_v48 }
 0x182   :  { %v267_v49 = vpop.f32.mrf.mxu0 }
 0x183   :  { %1068 = vst.msk [vmem:[#allocation2] sm:$0xff] %vm1067_vm2, %v267_v49 }
 0x188   :  { %v1168_v50 = vpop.f32.mrf.mxu0 }
 0x189   :  { %1073 = vst.msk [vmem:[#allocation2 + $0x28] sm:$0xff] %vm1067_vm2, %v1168_v50 }
 0x18a   :  { %v493_v51 = vpop.f32.mrf.mxu0 }
 0x18b   :  { %1072 = vst.msk [vmem:[#allocation2 + $0x20] sm:$0xff] %vm1067_vm2, %v493_v51  ;;  %v1161_v52 = vpop.f32.mrf.mxu1 }
 0x18c   :  { %1071 = vst.msk [vmem:[#allocation2 + $0x18] sm:$0xff] %vm1067_vm2, %v1161_v52 }
 0x18d   :  { %v380_v53 = vpop.f32.mrf.mxu1 }
 0x18e   :  { %1070 = vst.msk [vmem:[#allocation2 + $0x10] sm:$0xff] %vm1067_vm2, %v380_v53 }
 0x190   :  { %v1175_v54 = vpop.f32.mrf.mxu1 }
 0x191   :  { %1075 = vst.msk [vmem:[#allocation2 + $0x38] sm:$0xff] %vm1067_vm2, %v1175_v54 }
 0x192   :  { %v606_v55 = vpop.f32.mrf.mxu1 }
 0x193   :  { %1074 = vst.msk [vmem:[#allocation2 + $0x30] sm:$0xff] %vm1067_vm2, %v606_v55  ;;  %v1182_v56 = vpop.f32.mrf.mxu0 }
 0x194   :  { %1077 = vst.msk [vmem:[#allocation2 + $0x48] sm:$0xff] %vm1067_vm2, %v1182_v56 }
 0x195   :  { %v719_v57 = vpop.f32.mrf.mxu0 }
 0x196   :  { %1076 = vst.msk [vmem:[#allocation2 + $0x40] sm:$0xff] %vm1067_vm2, %v719_v57 }
 0x198   :  { %v1189_v58 = vpop.f32.mrf.mxu1 }
 0x199   :  { %1079 = vst.msk [vmem:[#allocation2 + $0x58] sm:$0xff] %vm1067_vm2, %v1189_v58 }
 0x19a   :  { %v832_v59 = vpop.f32.mrf.mxu1 }
 0x19b   :  { %1078 = vst.msk [vmem:[#allocation2 + $0x50] sm:$0xff] %vm1067_vm2, %v832_v59  ;;  %v1196_v60 = vpop.f32.mrf.mxu0 }
 0x19c   :  { %1081 = vst.msk [vmem:[#allocation2 + $0x68] sm:$0xff] %vm1067_vm2, %v1196_v60 }
 0x19d   :  { %v945_v61 = vpop.f32.mrf.mxu0 }
 0x19e   :  { %1080 = vst.msk [vmem:[#allocation2 + $0x60] sm:$0xff] %vm1067_vm2, %v945_v61 }
 0x1a0   :  { %v1203_v62 = vpop.f32.mrf.mxu1 }
 0x1a1   :  { %1083 = vst.msk [vmem:[#allocation2 + $0x78] sm:$0xff] %vm1067_vm2, %v1203_v62 }
 0x1a2   :  { %v1058_v63 = vpop.f32.mrf.mxu1 }
 0x1a3   :  { %1082 = vst.msk [vmem:[#allocation2 + $0x70] sm:$0xff] %vm1067_vm2, %v1058_v63 }
 0x1a4   :  { %1220 = shalt.err (!%p1217_p4)
}
 0x1a5   :  { %s1233_s28 = smov 128   ;;  %s1234_s29 = smov 8  }
 0x1a6   :  { %1095 = dma.vmem_to_hbm [thread:$0]  %s1090_s26, 2048, %s1481_s1, [#allocation3], %s1233_s28, %s1233_s28, %s1234_s29  }
 0x1a7   :  { %1229 = dma.done.wait [#allocation3], 2048  }
 0x1a8   :  { %1230 = vsyncadd [#allocation3], 4294965248 }
 0x1a9   :  { %1099 = vsyncpa [#allocation3], 1 }

</bundles_post_ra>
